<compile_context>
chip_gen: v6e
topology: v6e:2x2x1
jax: 0.10.0
libtpu: 0.0.40
codegen_flags: <defaults>
</compile_context>

<pallas_src>
import functools
import math

import jax
import jax.numpy as jnp
from jax.experimental import pallas as pl
from jax.experimental.pallas import tpu as pltpu

SMOOTH = 1.0
DICE_WEIGHT = 0.5
BCE_WEIGHT = 0.5


def _combined_loss_kernel(x_ref, t_ref, inter_ref, total_ref, bce_ref,
                          *, hw_eff, tile_l, ragged):
    """Grid: (row_blocks [parallel], lane chunks [arbitrary, reduction]).

    x_ref/t_ref: (row_block, tile_l) blocks of the (rows_eff, hw_eff) logits / targets.
    inter/total/bce refs: (row_block, 1) per-row partial sums, resident across the
    reduction axis (output block index is independent of the chunk index).
    """
    j = pl.program_id(1)

    @pl.when(j == 0)
    def _init():
        inter_ref[...] = jnp.zeros_like(inter_ref)
        total_ref[...] = jnp.zeros_like(total_ref)
        bce_ref[...] = jnp.zeros_like(bce_ref)

    def _accumulate(masked):
        x = x_ref[...].astype(jnp.float32)   # logits
        t = t_ref[...].astype(jnp.float32)   # targets in {0,1}

        # Share exp(-|x|) between the sigmoid (dice) and the stable BCE log term.
        e = jnp.exp(-jnp.abs(x))
        one_pe = 1.0 + e
        r = pl.reciprocal(one_pe, approx=True)     # EUP vrcp (frees VALU slots)
        r = r * (2.0 - r * one_pe)                 # one Newton step -> ~f32 accuracy
        sig = jnp.where(x >= 0.0, r, e * r)        # == sigmoid(x)

        inter_el = sig * t                                       # dice numerator terms
        total_el = sig + t                                       # dice denominator terms
        bce_el = jnp.maximum(x, 0.0) - x * t + jnp.log1p(e)      # stable BCE w/ logits

        if masked:
            # Only the ragged last chunk pays for the iota + compare + selects.
            col = j * tile_l + jax.lax.broadcasted_iota(jnp.int32, x.shape, 1)
            valid = col < hw_eff
            inter_el = jnp.where(valid, inter_el, 0.0)
            total_el = jnp.where(valid, total_el, 0.0)
            bce_el = jnp.where(valid, bce_el, 0.0)

        inter_ref[...] += jnp.sum(inter_el, axis=1, keepdims=True)
        total_ref[...] += jnp.sum(total_el, axis=1, keepdims=True)
        bce_ref[...] += jnp.sum(bce_el, axis=1, keepdims=True)

    if not ragged:
        _accumulate(masked=False)
    else:
        last = pl.num_programs(1) - 1

        @pl.when(j != last)
        def _full_tile():
            _accumulate(masked=False)

        @pl.when(j == last)
        def _ragged_tail():
            _accumulate(masked=True)


def _pick_row_block(rows_eff):
    """Row-block size: full array when small; 8-aligned divisor blocks when large."""
    if rows_eff <= 1024:
        return rows_eff
    for rb in (512, 256, 128, 64, 32, 16, 8):
        if rows_eff % rb == 0:
            return rb
    return rows_eff


def combined_loss(predictions, targets, *, target_block_bytes=4 * 1024 * 1024):
    """predictions, targets: NCHW arrays (logits / {0,1} targets). Returns scalar loss."""
    n, c, h, w = predictions.shape
    hw = h * w
    rows = n * c
    n_total = n * c * h * w

    # Sublane folding: if N*C is not a multiple of 8, fold a factor k of H*W into the
    # row axis so every vreg sublane carries data (free contiguous reshape).
    k = 1
    if rows % 8 != 0:
        need = 8 // math.gcd(rows, 8)
        if hw % need == 0 and hw // need >= 128:
            k = need
    rows_eff = rows * k
    hw_eff = hw // k

    # Free, contiguous reshape (no transpose, no pad, no extra HBM pass).
    x2 = predictions.reshape(rows_eff, hw_eff)
    t2 = targets.reshape(rows_eff, hw_eff)

    row_block = _pick_row_block(rows_eff)
    num_row_blocks = rows_eff // row_block

    # Lane tile: as large as the per-block byte budget allows (multiple of 128 lanes).
    itemsize = max(jnp.dtype(predictions.dtype).itemsize,
                   jnp.dtype(targets.dtype).itemsize)
    max_tile = max(128, (target_block_bytes // (row_block * itemsize)) // 128 * 128)

    if hw_eff <= max_tile:
        tile_l = hw_eff          # single chunk; block == full array dim, never masked
        ragged = False
    else:
        # Prefer a tile that divides hw_eff exactly (no masking at all), as long as it
        # stays within 2x of the budgeted tile width; otherwise mask only the last tile.
        tile_l = 0
        floor = max(128, (max_tile // 2 // 128) * 128)
        cand = max_tile
        while cand >= floor:
            if hw_eff % cand == 0:
                tile_l = cand
                ragged = False
                break
            cand -= 128
        if tile_l == 0:
            tile_l = max_tile
            ragged = True
    num_chunks = pl.cdiv(hw_eff, tile_l)

    kernel = functools.partial(
        _combined_loss_kernel, hw_eff=hw_eff, tile_l=tile_l, ragged=ragged)

    part_shape = jax.ShapeDtypeStruct((rows_eff, 1), jnp.float32)
    part_spec = pl.BlockSpec((row_block, 1), lambda i, j: (i, 0))
    in_spec = pl.BlockSpec((row_block, tile_l), lambda i, j: (i, j))

    inter, total, bce = pl.pallas_call(
        kernel,
        out_shape=(part_shape, part_shape, part_shape),
        grid_spec=pltpu.PrefetchScalarGridSpec(
            num_scalar_prefetch=0,
            grid=(num_row_blocks, num_chunks),
            in_specs=[in_spec, in_spec],
            out_specs=[part_spec, part_spec, part_spec],
        ),
        compiler_params=pltpu.CompilerParams(
            dimension_semantics=("parallel", "arbitrary"),
            vmem_limit_bytes=48 * 1024 * 1024),
    )(x2, t2)

    # Tiny finalize in plain JAX: fold rows (n, c, k) -> per-channel dice, global BCE mean.
    inter_c = inter.reshape(n, c, k).sum(axis=(0, 2))          # (C,)
    total_c = total.reshape(n, c, k).sum(axis=(0, 2))          # (C,)
    dice = (2.0 * inter_c + SMOOTH) / (total_c + SMOOTH)
    dice_loss = jnp.mean(1.0 - dice)                           # mean over channels
    bce_loss = jnp.sum(bce) / n_total                          # mean over all elements
    return DICE_WEIGHT * dice_loss + BCE_WEIGHT * bce_loss


def _reference_loss(predictions, targets):
    """Plain-JAX reference matching the PyTorch module exactly."""
    x = predictions.astype(jnp.float32)
    t = targets.astype(jnp.float32)
    sig = jax.nn.sigmoid(x)
    c = x.shape[1]
    dice_loss = 0.0
    for i in range(c):
        p = sig[:, i].reshape(-1)
        ti = t[:, i].reshape(-1)
        inter = jnp.sum(p * ti)
        total = jnp.sum(p) + jnp.sum(ti)
        dice = (2.0 * inter + SMOOTH) / (total + SMOOTH)
        dice_loss += 1.0 - dice
    dice_loss /= c
    bce = jnp.mean(jnp.maximum(x, 0.0) - x * t + jnp.log1p(jnp.exp(-jnp.abs(x))))
    return DICE_WEIGHT * dice_loss + BCE_WEIGHT * bce


if __name__ == "__main__":
    key = jax.random.PRNGKey(0)
    k1, k2 = jax.random.split(key)
    N, C, H, W = 2, 4, 16, 16
    predictions = jax.random.normal(k1, (N, C, H, W), dtype=jnp.float32)   # logits
    targets = (jax.random.uniform(k2, (N, C, H, W)) > 0.5).astype(jnp.float32)

    loss = combined_loss(predictions, targets)
    jax.block_until_ready(loss)

    ref = _reference_loss(predictions, targets)
    assert jnp.allclose(loss, ref, atol=2e-5, rtol=2e-5), (loss, ref)
    print("KERNEL_OK")
</pallas_src>

<mosaic_0001>
module attributes {stable_mosaic.version = 11 : i64} {
  func.func @_combined_loss_kernel(%arg0: i32, %arg1: i32, %arg2: memref<8x256xf32, #tpu.memory_space<vmem>>, %arg3: memref<8x256xf32, #tpu.memory_space<vmem>>, %arg4: memref<8x1xf32, #tpu.memory_space<vmem>>, %arg5: memref<8x1xf32, #tpu.memory_space<vmem>>, %arg6: memref<8x1xf32, #tpu.memory_space<vmem>>) attributes {dimension_semantics = [#tpu.dimension_semantics<parallel>, #tpu.dimension_semantics<arbitrary>], iteration_bounds = array<i64: 1, 1>, scalar_prefetch = 0 : i64, scratch_operands = 0 : i64, tpu.core_type = #tpu.core_type<tc>, window_params = [{transform_indices = @transform_0, window_bounds = array<i64: 8, 256>}, {transform_indices = @transform_1, window_bounds = array<i64: 8, 256>}, {transform_indices = @transform_2, window_bounds = array<i64: 8, 1>}, {transform_indices = @transform_3, window_bounds = array<i64: 8, 1>}, {transform_indices = @transform_4, window_bounds = array<i64: 8, 1>}]} {
    %c0_i32 = arith.constant 0 : i32
    %0 = arith.cmpi eq, %arg1, %c0_i32 : i32
    %1 = arith.extui %0 : i1 to i32
    %c0_i32_0 = arith.constant 0 : i32
    %2 = arith.cmpi ne, %1, %c0_i32_0 : i32
    scf.if %2 {
      %cst_23 = arith.constant 0.000000e+00 : f32
      %43 = vector.broadcast %cst_23 : f32 to vector<8x1xf32>
      %c0_24 = arith.constant 0 : index
      %c0_25 = arith.constant 0 : index
      %44 = vector.load %arg4[%c0_24, %c0_25] : memref<8x1xf32, #tpu.memory_space<vmem>>, vector<8x1xf32>
      tpu.vector_store %arg4[%c0_24, %c0_25], %43 {strides = array<i32>} : memref<8x1xf32, #tpu.memory_space<vmem>>, vector<8x1xf32>,
      %cst_26 = arith.constant 0.000000e+00 : f32
      %45 = vector.broadcast %cst_26 : f32 to vector<8x1xf32>
      %c0_27 = arith.constant 0 : index
      %c0_28 = arith.constant 0 : index
      %46 = vector.load %arg5[%c0_27, %c0_28] : memref<8x1xf32, #tpu.memory_space<vmem>>, vector<8x1xf32>
      tpu.vector_store %arg5[%c0_27, %c0_28], %45 {strides = array<i32>} : memref<8x1xf32, #tpu.memory_space<vmem>>, vector<8x1xf32>,
      %cst_29 = arith.constant 0.000000e+00 : f32
      %47 = vector.broadcast %cst_29 : f32 to vector<8x1xf32>
      %c0_30 = arith.constant 0 : index
      %c0_31 = arith.constant 0 : index
      %48 = vector.load %arg6[%c0_30, %c0_31] : memref<8x1xf32, #tpu.memory_space<vmem>>, vector<8x1xf32>
      tpu.vector_store %arg6[%c0_30, %c0_31], %47 {strides = array<i32>} : memref<8x1xf32, #tpu.memory_space<vmem>>, vector<8x1xf32>,
    } else {
    }
    %c0 = arith.constant 0 : index
    %c0_1 = arith.constant 0 : index
    %3 = vector.load %arg2[%c0, %c0_1] : memref<8x256xf32, #tpu.memory_space<vmem>>, vector<8x256xf32>
    %c0_2 = arith.constant 0 : index
    %c0_3 = arith.constant 0 : index
    %4 = vector.load %arg3[%c0_2, %c0_3] : memref<8x256xf32, #tpu.memory_space<vmem>>, vector<8x256xf32>
    %5 = math.absf %3 : vector<8x256xf32>
    %cst = arith.constant 0.000000e+00 : f32
    %6 = vector.broadcast %cst : f32 to vector<8x256xf32>
    %7 = arith.subf %6, %5 : vector<8x256xf32>
    %8 = math.exp %7 : vector<8x256xf32>
    %cst_4 = arith.constant 1.000000e+00 : f32
    %9 = vector.broadcast %cst_4 : f32 to vector<8x256xf32>
    %10 = arith.addf %9, %8 : vector<8x256xf32>
    %11 = tpu.reciprocal %10 {approx = true} : vector<8x256xf32> -> vector<8x256xf32>
    %12 = arith.mulf %11, %10 : vector<8x256xf32>
    %cst_5 = arith.constant 2.000000e+00 : f32
    %13 = vector.broadcast %cst_5 : f32 to vector<8x256xf32>
    %14 = arith.subf %13, %12 : vector<8x256xf32>
    %15 = arith.mulf %11, %14 : vector<8x256xf32>
    %cst_6 = arith.constant 0.000000e+00 : f32
    %16 = vector.broadcast %cst_6 : f32 to vector<8x256xf32>
    %17 = arith.cmpf oge, %3, %16 : vector<8x256xf32>
    %18 = arith.mulf %8, %15 : vector<8x256xf32>
    %19 = arith.select %17, %15, %18 : vector<8x256xi1>, vector<8x256xf32>
    %20 = arith.mulf %19, %4 : vector<8x256xf32>
    %21 = arith.addf %19, %4 : vector<8x256xf32>
    %cst_7 = arith.constant 0.000000e+00 : f32
    %22 = vector.broadcast %cst_7 : f32 to vector<8x256xf32>
    %23 = arith.maximumf %3, %22 : vector<8x256xf32>
    %24 = arith.mulf %3, %4 : vector<8x256xf32>
    %25 = arith.subf %23, %24 : vector<8x256xf32>
    %26 = math.log1p %8 : vector<8x256xf32>
    %27 = arith.addf %25, %26 : vector<8x256xf32>
    %c0_8 = arith.constant 0 : index
    %c0_9 = arith.constant 0 : index
    %28 = vector.load %arg4[%c0_8, %c0_9] : memref<8x1xf32, #tpu.memory_space<vmem>>, vector<8x1xf32>
    %cst_10 = arith.constant dense<0.000000e+00> : vector<8xf32>
    %29 = vector.multi_reduction <add>, %20, %cst_10 [1] : vector<8x256xf32> to vector<8xf32>
    %30 = vector.shape_cast %29 : vector<8xf32> to vector<8x1xf32>
    %31 = arith.addf %28, %30 : vector<8x1xf32>
    %c0_11 = arith.constant 0 : index
    %c0_12 = arith.constant 0 : index
    %32 = vector.load %arg4[%c0_11, %c0_12] : memref<8x1xf32, #tpu.memory_space<vmem>>, vector<8x1xf32>
    tpu.vector_store %arg4[%c0_11, %c0_12], %31 {strides = array<i32>} : memref<8x1xf32, #tpu.memory_space<vmem>>, vector<8x1xf32>,
    %c0_13 = arith.constant 0 : index
    %c0_14 = arith.constant 0 : index
    %33 = vector.load %arg5[%c0_13, %c0_14] : memref<8x1xf32, #tpu.memory_space<vmem>>, vector<8x1xf32>
    %cst_15 = arith.constant dense<0.000000e+00> : vector<8xf32>
    %34 = vector.multi_reduction <add>, %21, %cst_15 [1] : vector<8x256xf32> to vector<8xf32>
    %35 = vector.shape_cast %34 : vector<8xf32> to vector<8x1xf32>
    %36 = arith.addf %33, %35 : vector<8x1xf32>
    %c0_16 = arith.constant 0 : index
    %c0_17 = arith.constant 0 : index
    %37 = vector.load %arg5[%c0_16, %c0_17] : memref<8x1xf32, #tpu.memory_space<vmem>>, vector<8x1xf32>
    tpu.vector_store %arg5[%c0_16, %c0_17], %36 {strides = array<i32>} : memref<8x1xf32, #tpu.memory_space<vmem>>, vector<8x1xf32>,
    %c0_18 = arith.constant 0 : index
    %c0_19 = arith.constant 0 : index
    %38 = vector.load %arg6[%c0_18, %c0_19] : memref<8x1xf32, #tpu.memory_space<vmem>>, vector<8x1xf32>
    %cst_20 = arith.constant dense<0.000000e+00> : vector<8xf32>
    %39 = vector.multi_reduction <add>, %27, %cst_20 [1] : vector<8x256xf32> to vector<8xf32>
    %40 = vector.shape_cast %39 : vector<8xf32> to vector<8x1xf32>
    %41 = arith.addf %38, %40 : vector<8x1xf32>
    %c0_21 = arith.constant 0 : index
    %c0_22 = arith.constant 0 : index
    %42 = vector.load %arg6[%c0_21, %c0_22] : memref<8x1xf32, #tpu.memory_space<vmem>>, vector<8x1xf32>
    tpu.vector_store %arg6[%c0_21, %c0_22], %41 {strides = array<i32>} : memref<8x1xf32, #tpu.memory_space<vmem>>, vector<8x1xf32>,
    return
  }
  func.func @transform_0(%arg0: i32, %arg1: i32) -> (i32, i32) {
    %c0_i32 = arith.constant 0 : i32
    return %arg0, %arg1 : i32, i32
  }
  func.func @transform_1(%arg0: i32, %arg1: i32) -> (i32, i32) {
    %c0_i32 = arith.constant 0 : i32
    return %arg0, %arg1 : i32, i32
  }
  func.func @transform_2(%arg0: i32, %arg1: i32) -> (i32, i32) {
    %c0_i32 = arith.constant 0 : i32
    %c0_i32_0 = arith.constant 0 : i32
    return %arg0, %c0_i32 : i32, i32
  }
  func.func @transform_3(%arg0: i32, %arg1: i32) -> (i32, i32) {
    %c0_i32 = arith.constant 0 : i32
    %c0_i32_0 = arith.constant 0 : i32
    return %arg0, %c0_i32 : i32, i32
  }
  func.func @transform_4(%arg0: i32, %arg1: i32) -> (i32, i32) {
    %c0_i32 = arith.constant 0 : i32
    %c0_i32_0 = arith.constant 0 : i32
    return %arg0, %c0_i32 : i32, i32
  }
}

</mosaic_0001>

<bundles_post_ra>
// kernel: tpu_custom_call.1
= control target key start
LH: loop header
LB: loop body
LE: loop exit
PB: predicated region body
PF: predicated region fallthrough
CT: control target
= control target key end

     0   :  { %10 = vsyncpa [#allocation3], 0  ;;  %s263_s0 = inlined_call_operand.hbm [shape: f32[8,256], index: 0, kind: input, shape index: {}]   ;;  %s264_s1 = inlined_call_operand.hbm [shape: f32[8,256], index: 1, kind: input, shape index: {}]   ;;  %s265_s2 = inlined_call_operand.vmem [shape: f32[8,1], index: 2, kind: output, shape index: {0}]   ;;  %s266_s3 = inlined_call_operand.vmem [shape: f32[8,1], index: 3, kind: output, shape index: {1}]   ;;  %s267_s4 = inlined_call_operand.vmem [shape: f32[8,1], index: 4, kind: output, shape index: {2}]  }
   0x1   :  { %11 = vsyncpa [#allocation5], 0  ;;  %s196_s15 = smov [#allocation2]   ;;  %s197_s17 = smov [#allocation4]  }
   0x2   :  { %s18_s16 = sshll.u32 %s196_s15, 4  ;;  %s28_s18 = sshll.u32 %s197_s17, 4  ;;  %s19_s16 = int_to_ptr.vmem [resolvable:$true] %s18_s16  ;;  %s29_s18 = int_to_ptr.vmem [resolvable:$true] %s28_s18 }
   0x3   :  { %s160_s19 = scalar_lea.vmem %s19_s16, 256  ;;  %p165_p1 = scmp.lt.s32.totalorder %s19_s16, %s19_s16 }
   0x4   :  { %p161_p0 = scmp.ne.s32.totalorder %s19_s16, %s160_s19  ;;  %p166_p2 = scmp.lt.s32.totalorder %s160_s19, %s160_s19 }
   0x6   :  { %p167_p3 = por %p166_p2, %p165_p1 }
   0x8   :  { %p168_p4 = pnand %p167_p3, %p161_p0 }
   0xa   :  { %171 = shalt.err (!%p168_p4)
}
   0xb   :  { %21 = dma.hbm_to_vmem [thread:$0]  %s263_s0, 256, %s19_s16, [#allocation3]  }
   0xc   :  { %s180_s22 = scalar_lea.vmem %s29_s18, 256  ;;  %p185_p6 = scmp.lt.s32.totalorder %s29_s18, %s29_s18 }
   0xd   :  { %p181_p5 = scmp.ne.s32.totalorder %s29_s18, %s180_s22  ;;  %p186_p7 = scmp.lt.s32.totalorder %s180_s22, %s180_s22 }
   0xf   :  { %p187_p8 = por %p186_p7, %p185_p6 }
  0x11   :  { %p188_p9 = pnand %p187_p8, %p181_p5 }
  0x13   :  { %191 = shalt.err (!%p188_p9)
}
  0x14   :  { %31 = dma.hbm_to_vmem [thread:$0]  %s264_s1, 256, %s29_s18, [#allocation5]  }
  0x15   :  { %192 = dma.done.wait [#allocation3], 256  }
  0x16   :  { %193 = vsyncadd [#allocation3], 4294967040 }
  0x17   :  { %194 = dma.done.wait [#allocation5], 256  }
  0x18   :  { %195 = vsyncadd [#allocation5], 4294967040  ;;  %vm42_vm0 = vcmask 7168   ;;  %v198_v0 = vmov 0.0   ;;  %v46_v1 = vld [vmem:[#allocation2] sm:$0xff]  ;;  %v47_v2 = vld [vmem:[#allocation2 + $0x8] sm:$0xff] }
  0x19   :  { %43 = vst.msk [vmem:[%s265_s2] sm:$0xff] %vm42_vm0, %v198_v0  ;;  %44 = vst.msk [vmem:[%s266_s3] sm:$0xff] %vm42_vm0, %v198_v0  ;;  %v50_v3 = vand.u32 2147483647, %v46_v1  ;;  %v51_v4 = vand.u32 2147483647, %v47_v2 }
  0x1a   :  { %45 = vst.msk [vmem:[%s267_s4] sm:$0xff] %vm42_vm0, %v198_v0  ;;  %v48_v15 = vld [vmem:[#allocation4] sm:$0xff]  ;;  %v49_v16 = vld [vmem:[#allocation4 + $0x8] sm:$0xff]  ;;  %v78_v18 = vmax.f32 %v46_v1, 0.0  ;;  %v79_v22 = vmax.f32 %v47_v2, 0.0  ;;  %vm68_vm3 = vcmp.ge.f32.partialorder %v46_v1, 0.0 }
  0x1b   :  { %v52_v5 = vsub.f32 0.0, %v50_v3  ;;  %v53_v6 = vsub.f32 0.0, %v51_v4  ;;  %v80_v19 = vmul.f32 %v48_v15, %v46_v1  ;;  %v81_v23 = vmul.f32 %v49_v16, %v47_v2 }
  0x1c   :  { %vm69_vm4 = vcmp.ge.f32.partialorder %v47_v2, 0.0 }
  0x1d   :  { %v54_v7 = vmul.f32 1.442695, %v52_v5  ;;  %v56_v8 = vmul.f32 1.442695, %v53_v6  ;;  %v82_v31 = vsub.f32 %v78_v18, %v80_v19  ;;  %v83_v35 = vsub.f32 %v79_v22, %v81_v23 }
  0x1f   :  { %140 = vpow2.f32 %v54_v7 }
  0x20   :  { %142 = vpow2.f32 %v56_v8  ;;  %v104_v59 = vld [vmem:[%s265_s2] sm:$0xff] }
  0x21   :  { %v117_v56 = vld [vmem:[%s267_s4] sm:$0xff] }
  0x22   :  { %v111_v62 = vld [vmem:[%s266_s3] sm:$0xff] }
  0x2c   :  { %v141_v9 = vpop.eup %140 }
  0x2d   :  { %v143_v10 = vpop.eup %142  ;;  %v58_v11 = vadd.f32 1.0, %v141_v9  ;;  %v87_v13 = vmul.f32 -0.5, %v141_v9  ;;  %v90_v20 = vand.u32 2147483647, %v141_v9 }
  0x2e   :  { %v59_v12 = vadd.f32 1.0, %v143_v10  ;;  %v96_v14 = vmul.f32 -0.5, %v143_v10  ;;  %v99_v24 = vand.u32 2147483647, %v143_v10 }
  0x2f   :  { %144 = vrcp.f32 %v58_v11  ;;  %v88_v17 = vadd.f32 1.0, %v87_v13  ;;  %vm91_vm1 = vcmp.lt.f32.partialorder %v90_v20, 0.0004427343 }
  0x30   :  { %146 = vrcp.f32 %v59_v12  ;;  %v97_v21 = vadd.f32 1.0, %v96_v14  ;;  %vm100_vm2 = vcmp.lt.f32.partialorder %v99_v24, 0.0004427343 }
  0x31   :  { %148 = vlog2.f32 %v58_v11  ;;  %v89_v28 = vmul.f32 %v141_v9, %v88_v17 }
  0x32   :  { %150 = vlog2.f32 %v59_v12  ;;  %v98_v32 = vmul.f32 %v143_v10, %v97_v21 }
  0x3c   :  { %v145_v25 = vpop.eup %144 }
  0x3d   :  { %v147_v26 = vpop.eup %146  ;;  %v62_v27 = vmul.f32 %v145_v25, %v58_v11 }
  0x3e   :  { %v149_v29 = vpop.eup %148  ;;  %v63_v30 = vmul.f32 %v147_v26, %v59_v12 }
  0x3f   :  { %v151_v33 = vpop.eup %150  ;;  %v64_v34 = vsub.f32 2.0, %v62_v27  ;;  %v86_v36 = vmul.f32 0.6931472, %v149_v29 }
  0x40   :  { %v65_v37 = vsub.f32 2.0, %v63_v30  ;;  %v95_v38 = vmul.f32 0.6931472, %v151_v33 }
  0x41   :  { %v66_v39 = vmul.f32 %v145_v25, %v64_v34  ;;  %v92_v40 = vsel %vm91_vm1, %v89_v28, %v86_v36 }
  0x42   :  { %v67_v41 = vmul.f32 %v147_v26, %v65_v37  ;;  %v101_v42 = vsel %vm100_vm2, %v98_v32, %v95_v38  ;;  %v102_v43 = vadd.f32 %v92_v40, %v82_v31 }
  0x43   :  { %v70_v44 = vmul.f32 %v141_v9, %v66_v39  ;;  %v103_v45 = vadd.f32 %v101_v42, %v83_v35 }
  0x44   :  { %v71_v46 = vmul.f32 %v143_v10, %v67_v41 }
  0x45   :  { %v72_v47 = vsel %vm68_vm3, %v66_v39, %v70_v44  ;;  %v118_v48 = vadd.f32 %v103_v45, %v102_v43 }
  0x46   :  { %v73_v49 = vsel %vm69_vm4, %v67_v41, %v71_v46  ;;  %v74_v50 = vmul.f32 %v72_v47, %v48_v15  ;;  %v76_v52 = vadd.f32 %v72_v47, %v48_v15 }
  0x47   :  { %v75_v51 = vmul.f32 %v73_v49, %v49_v16  ;;  %119 = vadd.xlane.f32.xlu1 %v118_v48  ;;  %v77_v53 = vadd.f32 %v73_v49, %v49_v16 }
  0x49   :  { %v105_v54 = vadd.f32 %v75_v51, %v74_v50  ;;  %v112_v55 = vadd.f32 %v77_v53, %v76_v52 }
  0x4b   :  { %106 = vadd.xlane.f32.xlu0 %v105_v54 }
  0x4f   :  { %113 = vadd.xlane.f32.xlu0 %v112_v55 }
  0xd0   :  { %v120_v57 = vpop.xlane.xlu1 %119 }
  0xd1   :  { %v121_v58 = vadd.f32 %v120_v57, %v117_v56 }
  0xd3   :  { %122 = vst.msk [vmem:[%s267_s4] sm:$0xff] %vm42_vm0, %v121_v58 }
  0xd4   :  { %v107_v60 = vpop.xlane.xlu0 %106 }
  0xd5   :  { %v108_v61 = vadd.f32 %v107_v60, %v104_v59 }
  0xd7   :  { %110 = vst.msk [vmem:[%s265_s2] sm:$0xff] %vm42_vm0, %v108_v61 }
  0xd8   :  { %v114_v63 = vpop.xlane.xlu0 %113 }
  0xd9   :  { %v115_v0 = vadd.f32 %v114_v63, %v111_v62 }
  0xdb   :  { %116 = vst.msk [vmem:[%s266_s3] sm:$0xff] %vm42_vm0, %v115_v0 }
  0xdc   :  { %135 = vsyncpa [#allocation3], 1 }
  0xdd   :  { %136 = vsyncpa [#allocation5], 1 }

</bundles_post_ra>
